<compile_context>
chip_gen: v7x
topology: tpu7x:2x2x1
jax: 0.10.0
libtpu: 0.0.40
codegen_flags: <defaults>
</compile_context>

<pallas_src>
import functools

import jax
import jax.numpy as jnp
from jax import lax
from jax.experimental import pallas as pl
from jax.experimental.pallas import tpu as pltpu


def _round_up(x, m):
    return (x + m - 1) // m * m


# ----------------------------------------------------------------------------
# Pallas kernel 1: tiled fused matmul
#   o = [relu]( (x @ w) + shift [+ residual] )
# x/w are cast to bf16 (MXU-native); accumulation happens in a f32 VMEM scratch
# across the K grid axis (init/finalize via pl.when).  The BatchNorm scale is
# folded into w in the wrapper, so only a per-column shift enters the kernel.
# ----------------------------------------------------------------------------
def _dense_kernel(*refs, apply_relu, has_residual):
    if has_residual:
        x_ref, w_ref, shift_ref, r_ref, o_ref, acc_ref = refs
    else:
        x_ref, w_ref, shift_ref, o_ref, acc_ref = refs
        r_ref = None
    k = pl.program_id(2)

    @pl.when(k == 0)
    def _():
        acc_ref[...] = jnp.zeros_like(acc_ref)

    acc_ref[...] += jnp.dot(x_ref[...], w_ref[...],
                            preferred_element_type=jnp.float32)

    @pl.when(k == pl.num_programs(2) - 1)
    def _():
        y = acc_ref[...] + shift_ref[...]
        if has_residual:
            y = y + r_ref[...]
        if apply_relu:
            y = jnp.maximum(y, 0.0)
        o_ref[...] = y.astype(o_ref.dtype)


def dense(x, w, shift, *, relu, residual=None):
    """x: (M,K) f32, w: (K,N) f32 (BN scale pre-folded), shift: (1,N) f32 -> (M,N) f32."""
    M, K = x.shape
    N = w.shape[1]
    # Tile sizes: biggest that fits comfortably in VMEM on all generations
    # (v7x has only 64 MiB).  Awkward dims (e.g. K=147 stem, N=64 stem output)
    # are padded up to lane/sublane multiples so stores are lane-dense.
    TM = min(256, _round_up(M, 8))
    TN = min(256, _round_up(N, 128))
    TK = min(512, _round_up(K, 128))
    Mp, Np, Kp = _round_up(M, TM), _round_up(N, TN), _round_up(K, TK)

    xp = jnp.pad(x, ((0, Mp - M), (0, Kp - K))).astype(jnp.bfloat16)
    wp = jnp.pad(w, ((0, Kp - K), (0, Np - N))).astype(jnp.bfloat16)
    sp = jnp.pad(shift, ((0, 0), (0, Np - N)))

    args = [xp, wp, sp]
    in_specs = [
        pl.BlockSpec((TM, TK), lambda i, j, k: (i, k)),
        pl.BlockSpec((TK, TN), lambda i, j, k: (k, j)),
        pl.BlockSpec((1, TN), lambda i, j, k: (0, j)),
    ]
    if residual is not None:
        rp = jnp.pad(residual, ((0, Mp - M), (0, Np - N)))
        args.append(rp)
        in_specs.append(pl.BlockSpec((TM, TN), lambda i, j, k: (i, j)))

    kernel = functools.partial(_dense_kernel, apply_relu=relu,
                               has_residual=residual is not None)
    out = pl.pallas_call(
        kernel,
        grid=(Mp // TM, Np // TN, Kp // TK),
        in_specs=in_specs,
        out_specs=pl.BlockSpec((TM, TN), lambda i, j, k: (i, j)),
        out_shape=jax.ShapeDtypeStruct((Mp, Np), jnp.float32),
        scratch_shapes=[pltpu.VMEM((TM, TN), jnp.float32)],
        compiler_params=pltpu.CompilerParams(
            dimension_semantics=("parallel", "parallel", "arbitrary"),
            vmem_limit_bytes=32 * 1024 * 1024),  # tiles use ~3 MiB; fits v7x's 64 MiB
    )(*args)
    return out[:M, :N]


# ----------------------------------------------------------------------------
# Pallas kernel 2: 2-layer LSTM recurrence (PyTorch gate order i,f,g,o) + head.
# The layer-0 input projection (x @ Wih0 + b0) is precomputed outside (one big
# matmul through `dense`); inside the loop only the small recurrent dots run.
# Layer-1 uses a single fused dot on [h0; h1] @ [Wih1; Whh1].
# ----------------------------------------------------------------------------
def _lstm_head_kernel(xp_ref, whh0_ref, w1_ref, b1_ref,
                      fw1_ref, fb1_ref, fw2_ref, fb2_ref, o_ref):
    T, B, G = xp_ref.shape
    H = G // 4
    whh0 = whh0_ref[...]
    w1 = w1_ref[...]
    b1 = b1_ref[...]

    def gates(z, c):
        i = jax.nn.sigmoid(z[:, 0:H])
        f = jax.nn.sigmoid(z[:, H:2 * H])
        g = jnp.tanh(z[:, 2 * H:3 * H])
        o = jax.nn.sigmoid(z[:, 3 * H:4 * H])
        c_new = f * c + i * g
        h_new = o * jnp.tanh(c_new)
        return h_new, c_new

    def step(t, carry):
        h0, c0, h1, c1 = carry
        # layer 0: input projection already precomputed (includes b0)
        z0 = xp_ref[t] + jnp.dot(h0, whh0, preferred_element_type=jnp.float32)
        h0, c0 = gates(z0, c0)
        # layer 1: one dot on concatenated [h0; h1]
        z1 = jnp.dot(jnp.concatenate([h0, h1], axis=1), w1,
                     preferred_element_type=jnp.float32) + b1
        h1, c1 = gates(z1, c1)
        return (h0, c0, h1, c1)

    zeros = jnp.zeros((B, H), jnp.float32)
    _, _, h1, _ = lax.fori_loop(0, T, step, (zeros, zeros, zeros, zeros),
                                unroll=True)

    x = jnp.maximum(h1, 0.0)                                     # relu(out[:, -1, :])
    x = jnp.dot(x, fw1_ref[...], preferred_element_type=jnp.float32) + fb1_ref[...]
    x = jnp.maximum(x, 0.0)                                      # relu(fc1)
    o_ref[...] = jnp.dot(x, fw2_ref[...],
                         preferred_element_type=jnp.float32) + fb2_ref[...]


def lstm_head(feats, p):
    """feats: (B, T, 2048) f32 -> logits (B, num_classes) f32."""
    B, T, IN = feats.shape
    H = p["whh0"].shape[0]
    num_classes = p["fc2_w"].shape[1]

    # Hoisted layer-0 input projection for all timesteps: (B*T, IN) @ (IN, 4H) + b0
    xproj = dense(feats.reshape(B * T, IN), p["wih0"], p["b0"], relu=False)
    xproj = xproj.reshape(B, T, 4 * H).transpose(1, 0, 2)        # (T, B, 4H)

    w1cat = jnp.concatenate([p["wih1"], p["whh1"]], axis=0)      # (2H, 4H)

    # No grid: single invocation, whole (small) arrays resident in VMEM.
    return pl.pallas_call(
        _lstm_head_kernel,
        out_shape=jax.ShapeDtypeStruct((B, num_classes), jnp.float32),
    )(xproj, p["whh0"], w1cat, p["b1"],
      p["fc1_w"], p["fc1_b"], p["fc2_w"], p["fc2_b"])


# ----------------------------------------------------------------------------
# ResNet50 glue (im2col / pooling / parameter bookkeeping in plain JAX)
# ----------------------------------------------------------------------------
def _im2col(x, kh, kw, stride, pad):
    """x: (B, H, W, C) -> ((B*oh*ow, kh*kw*C), oh, ow)."""
    # TODO(synk): 3x3/7x7 patch matrices are materialized in HBM; fusing the
    # patch extraction into the matmul kernel would cut ~9x HBM traffic.
    if pad > 0:
        x = jnp.pad(x, ((0, 0), (pad, pad), (pad, pad), (0, 0)))
    B, Hp, Wp, C = x.shape
    oh = (Hp - kh) // stride + 1
    ow = (Wp - kw) // stride + 1
    cols = [x[:, i:i + stride * oh:stride, j:j + stride * ow:stride, :]
            for i in range(kh) for j in range(kw)]
    patches = jnp.stack(cols, axis=3)        # (B, oh, ow, kh*kw, C)
    return patches.reshape(B * oh * ow, kh * kw * C), oh, ow


def conv_bn(x, p, *, stride, pad, relu, residual=None):
    """Conv (no bias) + folded BatchNorm [+ residual] [+ relu], NHWC."""
    B = x.shape[0]
    O, I, kh, kw = p["w"].shape
    eps = 1e-5
    scale = p["gamma"] / jnp.sqrt(p["var"] + eps)                # (O,)
    shift = (p["beta"] - p["mean"] * scale).reshape(1, O)

    if kh == 1 and kw == 1 and pad == 0:
        # 1x1 conv: no patch extraction needed, just (optional) spatial stride.
        xs = x[:, ::stride, ::stride, :] if stride > 1 else x
        oh, ow = xs.shape[1], xs.shape[2]
        patches = xs.reshape(B * oh * ow, I)
        w2d = p["w"].reshape(O, I).T                             # (I, O)
    else:
        patches, oh, ow = _im2col(x, kh, kw, stride, pad)
        w2d = jnp.transpose(p["w"], (2, 3, 1, 0)).reshape(kh * kw * I, O)

    w2d = w2d * scale.reshape(1, O)                              # fold BN scale into W
    res2d = None if residual is None else residual.reshape(B * oh * ow, O)
    y = dense(patches, w2d, shift, relu=relu, residual=res2d)
    return y.reshape(B, oh, ow, O)


def maxpool_3x3_s2_p1(x):
    B, H, W, C = x.shape
    xp = jnp.pad(x, ((0, 0), (1, 1), (1, 1), (0, 0)), constant_values=-jnp.inf)
    oh = (H + 2 - 3) // 2 + 1
    ow = (W + 2 - 3) // 2 + 1
    cols = [xp[:, i:i + 2 * oh:2, j:j + 2 * ow:2, :]
            for i in range(3) for j in range(3)]
    return jnp.max(jnp.stack(cols, axis=0), axis=0)


def bottleneck(x, p):
    s = p["stride"]
    if "downsample" in p:
        identity = conv_bn(x, p["downsample"], stride=s, pad=0, relu=False)
    else:
        identity = x
    out = conv_bn(x, p["conv1"], stride=1, pad=0, relu=True)
    out = conv_bn(out, p["conv2"], stride=s, pad=1, relu=True)
    # conv3 + BN + residual add + relu fused into the Pallas matmul kernel
    out = conv_bn(out, p["conv3"], stride=1, pad=0, relu=True, residual=identity)
    return out


def resnet50_features(x, params):
    """x: NHWC (B, H, W, 3) -> (B, 2048) features (fc = Identity)."""
    x = conv_bn(x, params["conv1"], stride=2, pad=3, relu=True)
    x = maxpool_3x3_s2_p1(x)
    for li in range(1, 5):
        for block in params[f"layer{li}"]:
            x = bottleneck(x, block)
    return jnp.mean(x, axis=(1, 2))          # adaptive avg-pool (1,1) + flatten


# ----------------------------------------------------------------------------
# Deterministic parameter construction
# ----------------------------------------------------------------------------
def _make_conv_bn(key, in_ch, out_ch, k):
    k1, k2, k3 = jax.random.split(key, 3)
    fan_in = in_ch * k * k
    return dict(
        w=jax.random.normal(k1, (out_ch, in_ch, k, k), jnp.float32)
          * jnp.sqrt(2.0 / fan_in),
        gamma=1.0 + 0.1 * jax.random.normal(k2, (out_ch,), jnp.float32),
        beta=0.1 * jax.random.normal(k3, (out_ch,), jnp.float32),
        mean=jnp.zeros((out_ch,), jnp.float32),
        var=jnp.ones((out_ch,), jnp.float32),
    )


def make_resnet50_params(key):
    params = {}
    key, k = jax.random.split(key)
    params["conv1"] = _make_conv_bn(k, 3, 64, 7)
    layer_cfg = [(64, 3, 1), (128, 4, 2), (256, 6, 2), (512, 3, 2)]
    in_ch = 64
    for li, (planes, blocks, stride) in enumerate(layer_cfg):
        layer = []
        for bi in range(blocks):
            s = stride if bi == 0 else 1
            key, k1, k2, k3, kd = jax.random.split(key, 5)
            block = {
                "conv1": _make_conv_bn(k1, in_ch, planes, 1),
                "conv2": _make_conv_bn(k2, planes, planes, 3),
                "conv3": _make_conv_bn(k3, planes, planes * 4, 1),
                "stride": s,
            }
            if s != 1 or in_ch != planes * 4:
                block["downsample"] = _make_conv_bn(kd, in_ch, planes * 4, 1)
            layer.append(block)
            in_ch = planes * 4
        params[f"layer{li + 1}"] = layer
    return params


def make_lstm_head_params(key, input_size=2048, hidden=128, num_classes=3):
    def u(k, shape, bound):
        return jax.random.uniform(k, shape, jnp.float32, -bound, bound)

    ks = jax.random.split(key, 12)
    hb = 1.0 / jnp.sqrt(hidden)
    p = {}
    # LSTM layer 0 (stored pre-transposed: (K, 4H)); bias = b_ih + b_hh
    p["wih0"] = u(ks[0], (4 * hidden, input_size), hb).T
    p["whh0"] = u(ks[1], (4 * hidden, hidden), hb).T
    p["b0"] = (u(ks[2], (4 * hidden,), hb) + u(ks[3], (4 * hidden,), hb)).reshape(1, -1)
    # LSTM layer 1
    p["wih1"] = u(ks[4], (4 * hidden, hidden), hb).T
    p["whh1"] = u(ks[5], (4 * hidden, hidden), hb).T
    p["b1"] = (u(ks[6], (4 * hidden,), hb) + u(ks[7], (4 * hidden,), hb)).reshape(1, -1)
    # fc1: 128 -> 64, fc2: 64 -> num_classes
    b1 = 1.0 / jnp.sqrt(hidden)
    p["fc1_w"] = u(ks[8], (64, hidden), b1).T
    p["fc1_b"] = u(ks[9], (64,), b1).reshape(1, -1)
    b2 = 1.0 / jnp.sqrt(64)
    p["fc2_w"] = u(ks[10], (num_classes, 64), b2).T
    p["fc2_b"] = u(ks[11], (num_classes,), b2).reshape(1, -1)
    return p


# ----------------------------------------------------------------------------
# MyEnsemble.forward
# ----------------------------------------------------------------------------
def my_ensemble_forward(x_3d, params):
    """x_3d: (B, C, T, H, W) f32, like PyTorch.  Returns (B, num_classes)."""
    B, C, T, H, W = x_3d.shape
    # Batch all T frames through the CNN at once: (B,C,T,H,W) -> (B*T, H, W, C)
    frames = jnp.transpose(x_3d, (0, 2, 3, 4, 1)).reshape(B * T, H, W, C)
    feats = resnet50_features(frames, params["resnet"])          # (B*T, 2048)
    feats = feats.reshape(B, T, -1)                              # (B, T, 2048)
    return lstm_head(feats, params["head"])


if __name__ == "__main__":
    key = jax.random.PRNGKey(0)
    k_x, k_res, k_head = jax.random.split(key, 3)

    # Small shapes: batch=2, RGB, seq=4 frames, 32x32 images (224 check relaxed).
    x_3d = jax.random.normal(k_x, (2, 3, 4, 32, 32), jnp.float32)

    params = {
        "resnet": make_resnet50_params(k_res),
        "head": make_lstm_head_params(k_head, input_size=2048, hidden=128,
                                      num_classes=3),
    }

    out = my_ensemble_forward(x_3d, params)
    out = jax.block_until_ready(out)
    assert out.shape == (2, 3) and out.dtype == jnp.float32
    print("KERNEL_OK")
</pallas_src>

<mosaic_0001>
module attributes {stable_mosaic.version = 11 : i64} {
  func.func @_dense_kernel(%arg0: i32, %arg1: i32, %arg2: i32, %arg3: memref<256x256xbf16, #tpu.memory_space<vmem>>, %arg4: memref<256x128xbf16, #tpu.memory_space<vmem>>, %arg5: memref<1x128xf32, #tpu.memory_space<vmem>>, %arg6: memref<256x128xf32, #tpu.memory_space<vmem>>, %arg7: memref<256x128xf32, #tpu.memory_space<vmem>>) attributes {dimension_semantics = [#tpu.dimension_semantics<parallel>, #tpu.dimension_semantics<parallel>, #tpu.dimension_semantics<arbitrary>], iteration_bounds = array<i64: 8, 1, 1>, scalar_prefetch = 0 : i64, scratch_operands = 1 : i64, tpu.core_type = #tpu.core_type<tc>, window_params = [{transform_indices = @transform_0, window_bounds = array<i64: 256, 256>}, {transform_indices = @transform_1, window_bounds = array<i64: 256, 128>}, {transform_indices = @transform_2, window_bounds = array<i64: 1, 128>}, {transform_indices = @transform_3, window_bounds = array<i64: 256, 128>}]} {
    %c0_i32 = arith.constant 0 : i32
    %0 = arith.cmpi eq, %arg2, %c0_i32 : i32
    %1 = arith.extui %0 : i1 to i32
    %c0_i32_0 = arith.constant 0 : i32
    %2 = arith.cmpi ne, %1, %c0_i32_0 : i32
    scf.if %2 {
      %cst_10 = arith.constant 0.000000e+00 : f32
      %12 = vector.broadcast %cst_10 : f32 to vector<256x128xf32>
      %c0_11 = arith.constant 0 : index
      %c0_12 = arith.constant 0 : index
      %13 = vector.load %arg7[%c0_11, %c0_12] : memref<256x128xf32, #tpu.memory_space<vmem>>, vector<256x128xf32>
      tpu.vector_store %arg7[%c0_11, %c0_12], %12 {strides = array<i32>} : memref<256x128xf32, #tpu.memory_space<vmem>>, vector<256x128xf32>,
    } else {
    }
    %c0 = arith.constant 0 : index
    %c0_1 = arith.constant 0 : index
    %3 = vector.load %arg7[%c0, %c0_1] : memref<256x128xf32, #tpu.memory_space<vmem>>, vector<256x128xf32>
    %c0_2 = arith.constant 0 : index
    %c0_3 = arith.constant 0 : index
    %4 = vector.load %arg3[%c0_2, %c0_3] : memref<256x256xbf16, #tpu.memory_space<vmem>>, vector<256x256xbf16>
    %c0_4 = arith.constant 0 : index
    %c0_5 = arith.constant 0 : index
    %5 = vector.load %arg4[%c0_4, %c0_5] : memref<256x128xbf16, #tpu.memory_space<vmem>>, vector<256x128xbf16>
    %cst = arith.constant dense<0.000000e+00> : vector<256x128xf32>
    %6 = tpu.matmul %4, %5, %cst {dimension_numbers = #tpu.dot_dimension_numbers<[1], [0], [0], [1], [0, 0, 1, 1], [], []>} : vector<256x256xbf16>, vector<256x128xbf16>, vector<256x128xf32> -> vector<256x128xf32>
    %7 = arith.addf %3, %6 : vector<256x128xf32>
    %c0_6 = arith.constant 0 : index
    %c0_7 = arith.constant 0 : index
    %8 = vector.load %arg7[%c0_6, %c0_7] : memref<256x128xf32, #tpu.memory_space<vmem>>, vector<256x128xf32>
    tpu.vector_store %arg7[%c0_6, %c0_7], %7 {strides = array<i32>} : memref<256x128xf32, #tpu.memory_space<vmem>>, vector<256x128xf32>,
    %c0_i32_8 = arith.constant 0 : i32
    %9 = arith.cmpi eq, %arg2, %c0_i32_8 : i32
    %10 = arith.extui %9 : i1 to i32
    %c0_i32_9 = arith.constant 0 : i32
    %11 = arith.cmpi ne, %10, %c0_i32_9 : i32
    scf.if %11 {
      %c0_10 = arith.constant 0 : index
      %c0_11 = arith.constant 0 : index
      %12 = vector.load %arg7[%c0_10, %c0_11] : memref<256x128xf32, #tpu.memory_space<vmem>>, vector<256x128xf32>
      %c0_12 = arith.constant 0 : index
      %c0_13 = arith.constant 0 : index
      %13 = vector.load %arg5[%c0_12, %c0_13] : memref<1x128xf32, #tpu.memory_space<vmem>>, vector<1x128xf32>
      %14 = vector.broadcast %13 : vector<1x128xf32> to vector<256x128xf32>
      %15 = arith.addf %12, %14 : vector<256x128xf32>
      %cst_14 = arith.constant 0.000000e+00 : f32
      %16 = vector.broadcast %cst_14 : f32 to vector<256x128xf32>
      %17 = arith.maximumf %15, %16 : vector<256x128xf32>
      %c0_15 = arith.constant 0 : index
      %c0_16 = arith.constant 0 : index
      %18 = vector.load %arg6[%c0_15, %c0_16] : memref<256x128xf32, #tpu.memory_space<vmem>>, vector<256x128xf32>
      tpu.vector_store %arg6[%c0_15, %c0_16], %17 {strides = array<i32>} : memref<256x128xf32, #tpu.memory_space<vmem>>, vector<256x128xf32>,
    } else {
    }
    return
  }
  func.func @transform_0(%arg0: i32, %arg1: i32, %arg2: i32) -> (i32, i32) {
    %c0_i32 = arith.constant 0 : i32
    return %arg0, %arg2 : i32, i32
  }
  func.func @transform_1(%arg0: i32, %arg1: i32, %arg2: i32) -> (i32, i32) {
    %c0_i32 = arith.constant 0 : i32
    return %arg2, %arg1 : i32, i32
  }
  func.func @transform_2(%arg0: i32, %arg1: i32, %arg2: i32) -> (i32, i32) {
    %c0_i32 = arith.constant 0 : i32
    %c0_i32_0 = arith.constant 0 : i32
    return %c0_i32, %arg1 : i32, i32
  }
  func.func @transform_3(%arg0: i32, %arg1: i32, %arg2: i32) -> (i32, i32) {
    %c0_i32 = arith.constant 0 : i32
    return %arg0, %arg1 : i32, i32
  }
}

</mosaic_0001>

<bundles_post_ra>
// kernel: tpu_custom_call.1
= control target key start
LH: loop header
LB: loop body
LE: loop exit
PB: predicated region body
PF: predicated region fallthrough
CT: control target
= control target key end

     0   :  { %8 = vsyncpa [#allocation4], 0  ;;  %s1985_s0 = inlined_call_operand.hbm [shape: bf16[2048,256], index: 0, kind: input, shape index: {}]   ;;  %s1986_s1 = inlined_call_operand.hbm [shape: bf16[256,128], index: 1, kind: input, shape index: {}]   ;;  %s1987_s2 = inlined_call_operand.vmem [shape: f32[1,128], index: 2, kind: input, shape index: {}]   ;;  %s1988_s3 = inlined_call_operand.hbm [shape: f32[2048,128], index: 3, kind: output, shape index: {}]  }
   0x1   :  { %10 = vsyncpa [#allocation4 + $0x1], 0 }
   0x2   :  { %11 = vsyncpa [#allocation7], 0 }
   0x3   :  { %12 = vsyncpa [#allocation5], 0 }
   0x4   :  { %14 = vsyncpa [#allocation5 + $0x1], 0  ;;  %s1658_s12 = smov 0   ;;  %s1660_s13 = smov 0  }
   0x5   :  { %s1662_s14 = smov 0   ;;  %s1664_s15 = smov 0  }
   0x6   :  { %s1666_s16 = smov 0   ;;  %s1668_s17 = smov 0  }
   0x7 LB: > { %s1141_s18 = sadd.s32 4294967295, %s1627_s17   ;;  %s1142_s19 = sadd.s32 4294967294, %s1627_s17   ;;  %s1627_s17 = sphi %s1668_s17, %s20_s17   ;;  %s1623_s16 = sphi %s1666_s16, %s2011_s16   ;;  %s1619_s15 = sphi %s1664_s15, %s2010_s15   ;;  %s1615_s14 = sphi %s1662_s14, %s2009_s14   ;;  %s1611_s13 = sphi %s1660_s13, %s2008_s13   ;;  %s1607_s12 = sphi %s1658_s12, %s2007_s12  }
   0x8   : > { %p61_p0 = scmp.ne.s32.totalorder %s1611_s13, %s1607_s12  ;;  %p1692_p1 = scmp.eq.s32.totalorder %s1141_s18, 0 }
   0x9   : > { %p1696_p2 = scmp.eq.s32.totalorder %s1141_s18, 7  ;;  %p147_p3 = scmp.eq.s32.totalorder %s1142_s19, 7 }
   0xa   : > { %s1993_s20 = scalar_select %p1692_p1, 1, 0 }
   0xb   : > { %s1994_s21 = scalar_select %p1696_p2, 1, 0 }
   0xc   : > { %p1702_p4 = por %p1692_p1, %p61_p0  ;;  %p1143_p5 = scmp.ge.s32.totalorder %s1627_s17, 1 }
   0xd   : > { %p1707_p6 = por %p147_p3, %p61_p0  ;;  %p154_p7 = scmp.lt.s32.totalorder %s1627_s17, 9 }
   0xe   : > { %s1995_s22 = scalar_select %p1702_p4, 1, 0 }
   0xf   : > { %s1996_s23 = scalar_select %p1707_p6, 1, 0 }
  0x10   : > { %p1712_p8 = pnand %p1143_p5, %p154_p7  ;;  %s1629_s25 = smov [#allocation6]  }
  0x11   : > { %s170_s26 = sshll.u32 %s1629_s25, 4  ;;  %s39_s28 = sadd.s32 1, %s1623_s16  ;;  %s171_s26 = int_to_ptr.vmem [resolvable:$true] %s170_s26 }
  0x12   : > { %s1997_s24 = scalar_select %p1712_p8, 1, 0 }
  0x13   : > { %p1348_p9 = pneg %p1712_p8  ;;  %s1483_s4 = scalar_lea.hbm %s1986_s1, 2048 }
  0x14   : > { %p1484_p11 = scmp.ne.s32.totalorder %s1986_s1, %s1483_s4  ;;  %p1490_p3 = scmp.lt.u32.totalorder %s1483_s4, %s1986_s1 }
  0x15   : > { %p1720_p10 = pnand %p1348_p9, %p1692_p1 }
  0x17   : > { %p1485_p12 = pneg %p1720_p10 }
  0x19   : > { %p1486_p13 = pnand %p1485_p12, %p1484_p11 }
  0x1b   : > { %p1487_p0 = pneg %p1486_p13 }
  0x1d   : > { %p1492_p5 = pnand %p1490_p3, %p1487_p0 }
  0x1f   : > { %1495 = shalt.err (!%p1492_p5)
}
  0x20   : > { %s1496_s9 = scalar_lea.vmem %s171_s26, 2048  ;;  %p1504_p1 = scmp.lt.s32.totalorder %s171_s26, %s171_s26 }
  0x21   : > { %p1497_p7 = scmp.ne.s32.totalorder %s171_s26, %s1496_s9  ;;  %p1505_p4 = scmp.lt.s32.totalorder %s1496_s9, %s1496_s9 }
  0x23   : > { %p1499_p9 = pnand %p1497_p7, %p1485_p12  ;;  %p1506_p8 = por %p1505_p4, %p1504_p1 }
  0x25   : > { %p1500_p6 = pneg %p1499_p9 }
  0x27   : > { %p1507_p2 = pnand %p1506_p8, %p1500_p6 }
  0x29   : > { %1510 = shalt.err (!%p1507_p2)
}
  0x2a   : > { %s1630_s10 = smov 64   ;;  %s1631_s11 = smov 4  }
  0x2b   : > { %1351 = dma.hbm_to_vmem [thread:$0]  (!%p1720_p10), %s1986_s1, 2048, %s171_s26, [#allocation7], %s1630_s10, %s1630_s10, %s1631_s11  }
  0x2c   : > { %p41_p1 = scmp.ge.s32.totalorder %s39_s28, 8  ;;  %s48_s25 = sadd.s32 1, %s1615_s14 }
  0x2d   : > { %p55_p2 = scmp.ne.s32.totalorder %s1615_s14, %s1611_s13  ;;  %p56_p4 = scmp.eq.s32.totalorder %s1627_s17, 0 }
  0x2e   : > { %s2013_s28 = smov (%p41_p1, %s39_s28), 0  ;;  %p2000_p8 = scmp.ne.s32.totalorder %s1994_s21, 0 }
  0x2f   : > { %p1747_p6 = por %p56_p4, %p55_p2  ;;  %s43_s27 = ssub.s32 %s1623_s16, %s2013_s28 }
  0x30   : > { %p1753_p11 = por %p2000_p8, %p55_p2  ;;  %p1361_p12 = scmp.lt.s32.totalorder %s1627_s17, 8 }
  0x31   : > { %p46_p10 = scmp.eq.s32.totalorder %s43_s27, 0  ;;  %s190_s26 = sand.u32 1, %s1615_s14  }
  0x32   : > { %s1147_s4 = sshll.u32 %s190_s26, 8  ;;  %s1210_s6 = sshll.u32 %s1623_s16, 12 }
  0x33   : > { %s1762_s5 = scalar_select %p46_p10, %s1615_s14, %s48_s25  }
  0x34   : > { %s1768_s9 = scalar_lea.hbm %s1985_s0, %s1210_s6  ;;  %s194_s21 = scalar_lea.vmem [#allocation3], %s1147_s4 }
  0x35   : > { %s204_s10 = sshll.u32 %s194_s21, 4  ;;  %p1774_p13 = pnand %p1361_p12, %p1747_p6  ;;  %s1770_s10 = int_to_ptr.vmem [resolvable:$true] %s204_s10 }
  0x36   : > { %s1778_s18 = scalar_lea.sflag [#allocation4], %s190_s26  ;;  %s1511_s19 = scalar_lea.hbm %s1768_s9, 4096 }
  0x37   : > { %p1512_p0 = scmp.ne.s32.totalorder %s1768_s9, %s1511_s19  ;;  %p1513_p3 = pneg %p1774_p13 }
  0x38   : > { %s1516_s29 = scalar_lea.hbm %s1985_s0, 32768  ;;  %p1517_p9 = scmp.lt.u32.totalorder %s1768_s9, %s1985_s0 }
  0x39   : > { %p1514_p5 = pnand %p1513_p3, %p1512_p0  ;;  %p1518_p1 = scmp.lt.u32.totalorder %s1516_s29, %s1511_s19 }
  0x3a   : > { %p1520_p4 = scmp.lt.u32.totalorder %s1511_s19, %s1768_s9 }
  0x3b   : > { %p1515_p7 = pneg %p1514_p5  ;;  %p1519_p2 = por %p1518_p1, %p1517_p9 }
  0x3d   : > { %p1521_p6 = por %p1520_p4, %p1519_p2 }
  0x3f   : > { %p1522_p8 = pnand %p1521_p6, %p1515_p7 }
  0x41   : > { %1525 = shalt.err (!%p1522_p8)
}
  0x42   : > { %s1526_s26 = scalar_lea.vmem %s1770_s10, 4096  ;;  %s1632_s7 = smov [#allocation3]  }
  0x43   : > { %p1527_p12 = scmp.ne.s32.totalorder %s1770_s10, %s1526_s26  ;;  %s1531_s8 = sshll.u32 %s1632_s7, 4  ;;  %s1532_s8 = int_to_ptr.vmem [resolvable:$false] %s1531_s8 }
  0x44   : > { %s1533_s21 = scalar_lea.vmem %s1532_s8, 8192  ;;  %p1534_p5 = scmp.lt.s32.totalorder %s1770_s10, %s1532_s8 }
  0x45   : > { %p1529_p10 = pnand %p1527_p12, %p1513_p3  ;;  %p1535_p9 = scmp.lt.s32.totalorder %s1533_s21, %s1526_s26 }
  0x47   : > { %p1530_p0 = pneg %p1529_p10  ;;  %p1536_p1 = por %p1535_p9, %p1534_p5 }
  0x49   : > { %p1537_p2 = pnand %p1536_p1, %p1530_p0 }
  0x4b   : > { %1540 = shalt.err (!%p1537_p2)
}
  0x4c   : > { %s1633_s19 = smov 128   ;;  %s1634_s25 = smov 8  }
  0x4d   : > { %1355 = dma.hbm_to_vmem [thread:$0]  (!%p1774_p13), %s1768_s9, 4096, %s1770_s10, %s1778_s18, %s1633_s19, %s1633_s19, %s1634_s25  }
  0x4e   : > { %p2003_p3 = scmp.ne.s32.totalorder %s1997_s24, 0 }
  0x4f   : > { %s1809_s27 = sand.u32 (!%p2003_p3), 1, %s1611_s13   ;;  %p2004_p7 = scmp.ne.s32.totalorder (!%p2003_p3), %s1995_s22, 0 }
  0x50   : > { %216 = sbr.rel (%p2003_p3) target bundleno = 416 (0x1a0), region = 32  ;;  %s1152_s29 = sshll.u32 (!%p2003_p3), %s1809_s27, 8 }
  0x51   : > { %s219_s4 = scalar_lea.sflag (!%p2003_p3), [#allocation4], %s1809_s27  ;;  %s1815_s6 = scalar_lea.vmem (!%p2003_p3), [#allocation3], %s1152_s29 }
  0x57   : > { %1594 = dma.done.wait (%p2004_p7), %s219_s4, 4096  }
  0x58   : > { %1596 = vsyncadd (%p2004_p7), %s219_s4, 4294963200  ;;  %p2005_p13 = scmp.ne.s32.totalorder %s1993_s20, 0 }
  0x5a   : > { %1598 = dma.done.wait (%p2005_p13), [#allocation7], 2048  }
  0x5b   : > { %1600 = vsyncadd (%p2005_p13), [#allocation7], 4294965248  ;;  %v1419_v0 = vld [vmem:[#allocation6 + $0x40] sm:$0xff]   ;;  %v1421_v2 = vld [vmem:[#allocation6 + $0x48] sm:$0xff]   ;;  %s1868_s24 = scalar_lea.vmem [#allocation8], %s1152_s29  ;;  %s1211_s9 = sshll.u32 %s1619_s15, 12 }
  0x5c   : > { %v1420_v1 = vld [vmem:[#allocation6] sm:$0xff]   ;;  %1212 = vmatprep.subr.bf16.mxu0 %v1419_v0  ;;  %1324 = vmatprep.subr.bf16.mxu1 %v1419_v0  ;;  %v1422_v3 = vld [vmem:[#allocation6 + $0x8] sm:$0xff]   ;;  %v1423_v4 = vld [vmem:[#allocation6 + $0x50] sm:$0xff]   ;;  %s1026_s10 = sshll.u32 %s1868_s24, 4  ;;  %s1931_s26 = scalar_lea.hbm %s1988_s3, %s1211_s9  ;;  %s1933_s10 = int_to_ptr.vmem [resolvable:$true] %s1026_s10 }
  0x5d   : > { %1213 = vmatpush3.bf16.msra.mxu0 %v1420_v1  ;;  %1332 = vmatpush3.bf16.msra.mxu1 %v1420_v1  ;;  %v1424_v5 = vld [vmem:[#allocation6 + $0x10] sm:$0xff]   ;;  %v1425_v6 = vld [vmem:[#allocation6 + $0x58] sm:$0xff]   ;;  %v1427_v8 = vld [vmem:[#allocation6 + $0x60] sm:$0xff]   ;;  %s1012_s15 = scalar_lea.sflag [#allocation5], %s1809_s27  ;;  %s1541_s7 = scalar_lea.vmem %s1933_s10, 4096 }
  0x5e   : > { %1214 = vmatprep.subr.bf16.mxu0 %v1421_v2  ;;  %1325 = vmatprep.subr.bf16.mxu1 %v1421_v2  ;;  %v1426_v7 = vld [vmem:[#allocation6 + $0x18] sm:$0xff]   ;;  %v1428_v9 = vld [vmem:[#allocation6 + $0x20] sm:$0xff]   ;;  %v1429_v10 = vld [vmem:[#allocation6 + $0x68] sm:$0xff]   ;;  %p1542_p4 = scmp.ne.s32.totalorder %s1933_s10, %s1541_s7  ;;  %s1635_s8 = smov [#allocation8]  }
  0x5f   : > { %v1437_v11 = vld [vmem:[%s1815_s6 + $0x4] ss:$8 sps:$4 sm:$0xff]   ;;  %v1431_v14 = vld [vmem:[#allocation6 + $0x70] sm:$0xff]   ;;  %v1433_v16 = vld [vmem:[#allocation6 + $0x78] sm:$0xff]   ;;  %s1545_s21 = sshll.u32 %s1635_s8, 4  ;;  %s1546_s21 = int_to_ptr.vmem [resolvable:$false] %s1545_s21 }
  0x60   : > { %v1440_v12 = vld [vmem:[%s1815_s6 + $0x84] ss:$8 sps:$4 sm:$0xff]   ;;  %680 = vmatprep.mubr.bf16.mxu0 %v1437_v11  ;;  %v1432_v15 = vld [vmem:[#allocation6 + $0x30] sm:$0xff]   ;;  %v1434_v17 = vld [vmem:[#allocation6 + $0x38] sm:$0xff]   ;;  %p1543_p6 = pnand %p1542_p4, %p1753_p11  ;;  %s1547_s19 = scalar_lea.vmem %s1546_s21, 8192 }
  0x61   : > { %1215 = vmatpush3.bf16.msra.mxu0 %v1422_v3  ;;  %1333 = vmatpush3.bf16.msra.mxu1 %v1422_v3  ;;  %v1430_v13 = vld [vmem:[#allocation6 + $0x28] sm:$0xff]   ;;  %v1441_v20 = vld [vmem:[%s1815_s6 + $0x14] ss:$8 sps:$4 sm:$0xff]   ;;  %v1445_v22 = vld [vmem:[%s1815_s6 + $0x10] ss:$8 sps:$4 sm:$0xff]   ;;  %p1548_p12 = scmp.lt.s32.totalorder %s1933_s10, %s1546_s21  ;;  %p1549_p10 = scmp.lt.s32.totalorder %s1547_s19, %s1541_s7 }
  0x62   : > { %1216 = vmatprep.subr.bf16.mxu0 %v1423_v4  ;;  %1326 = vmatprep.subr.bf16.mxu1 %v1423_v4  ;;  %v1435_v18 = vld [vmem:[%s1815_s6] ss:$8 sps:$4 sm:$0xff]   ;;  %v1443_v21 = vld [vmem:[%s1815_s6 + $0x94] ss:$8 sps:$4 sm:$0xff]   ;;  %v1446_v23 = vld [vmem:[%s1815_s6 + $0x90] ss:$8 sps:$4 sm:$0xff]   ;;  %p1544_p8 = pneg %p1543_p6 }
  0x63   : > { %744 = vmatprep.mubr.bf16.mxu1 %v1440_v12  ;;  %v1438_v19 = vld [vmem:[%s1815_s6 + $0x80] ss:$8 sps:$4 sm:$0xff]   ;;  %v1447_v24 = vld [vmem:[%s1815_s6 + $0x24] ss:$8 sps:$4 sm:$0xff]   ;;  %v1453_v28 = vld [vmem:[%s1815_s6 + $0x34] ss:$8 sps:$4 sm:$0xff]   ;;  %p1550_p0 = por %p1549_p10, %p1548_p12 }
  0x64   : > { %v1449_v25 = vld [vmem:[%s1815_s6 + $0xa4] ss:$8 sps:$4 sm:$0xff]   ;;  %v1451_v26 = vld [vmem:[%s1815_s6 + $0x20] ss:$8 sps:$4 sm:$0xff]   ;;  %v1455_v29 = vld [vmem:[%s1815_s6 + $0xb4] ss:$8 sps:$4 sm:$0xff]  }
  0x65   : > { %1217 = vmatpush3.bf16.msra.mxu0 %v1424_v5  ;;  %1334 = vmatpush3.bf16.msra.mxu1 %v1424_v5  ;;  %v1452_v27 = vld [vmem:[%s1815_s6 + $0xa0] ss:$8 sps:$4 sm:$0xff]   ;;  %v1457_v30 = vld [vmem:[%s1815_s6 + $0x30] ss:$8 sps:$4 sm:$0xff]   ;;  %v1459_v32 = vld [vmem:[%s1815_s6 + $0x44] ss:$8 sps:$4 sm:$0xff]   ;;  %p1551_p5 = pnand %p1550_p0, %p1544_p8 }
  0x66   : > { %1218 = vmatprep.subr.bf16.mxu0 %v1425_v6  ;;  %1327 = vmatprep.subr.bf16.mxu1 %v1425_v6  ;;  %v1458_v31 = vld [vmem:[%s1815_s6 + $0xb0] ss:$8 sps:$4 sm:$0xff]   ;;  %v1461_v33 = vld [vmem:[%s1815_s6 + $0xc4] ss:$8 sps:$4 sm:$0xff]   ;;  %v1463_v34 = vld [vmem:[%s1815_s6 + $0x40] ss:$8 sps:$4 sm:$0xff]  }
  0x67   : > { %v1464_v35 = vld [vmem:[%s1815_s6 + $0xc0] ss:$8 sps:$4 sm:$0xff]   ;;  %v1465_v36 = vld [vmem:[%s1815_s6 + $0x54] ss:$8 sps:$4 sm:$0xff]   ;;  %v1469_v38 = vld [vmem:[%s1815_s6 + $0x50] ss:$8 sps:$4 sm:$0xff]  }
  0x68   : > { %v1467_v37 = vld [vmem:[%s1815_s6 + $0xd4] ss:$8 sps:$4 sm:$0xff]   ;;  %v1470_v39 = vld [vmem:[%s1815_s6 + $0xd0] ss:$8 sps:$4 sm:$0xff]   ;;  %v1471_v40 = vld [vmem:[%s1815_s6 + $0x64] ss:$8 sps:$4 sm:$0xff]  }
  0x69   : > { %1219 = vmatpush3.bf16.msra.mxu0 %v1426_v7  ;;  %1335 = vmatpush3.bf16.msra.mxu1 %v1426_v7  ;;  %v1473_v41 = vld [vmem:[%s1815_s6 + $0xe4] ss:$8 sps:$4 sm:$0xff]   ;;  %v1475_v42 = vld [vmem:[%s1815_s6 + $0x60] ss:$8 sps:$4 sm:$0xff]   ;;  %v1477_v44 = vld [vmem:[%s1815_s6 + $0x74] ss:$8 sps:$4 sm:$0xff]  }
  0x6a   : > { %1220 = vmatprep.subr.bf16.mxu0 %v1427_v8  ;;  %1328 = vmatprep.subr.bf16.mxu1 %v1427_v8  ;;  %v1476_v43 = vld [vmem:[%s1815_s6 + $0xe0] ss:$8 sps:$4 sm:$0xff]   ;;  %v1479_v45 = vld [vmem:[%s1815_s6 + $0xf4] ss:$8 sps:$4 sm:$0xff]   ;;  %v1481_v46 = vld [vmem:[%s1815_s6 + $0x70] ss:$8 sps:$4 sm:$0xff]  }
  0x6b   : > { %v1482_v47 = vld [vmem:[%s1815_s6 + $0xf0] ss:$8 sps:$4 sm:$0xff]   ;;  %v1860_v51 = vld [vmem:[%s1987_s2] ss:$0 sm:$0xff] }
  0x6d   : > { %1221 = vmatpush3.bf16.msra.mxu0 %v1428_v9  ;;  %1336 = vmatpush3.bf16.msra.mxu1 %v1428_v9 }
  0x6e   : > { %1222 = vmatprep.subr.bf16.mxu0 %v1429_v10  ;;  %1329 = vmatprep.subr.bf16.mxu1 %v1429_v10 }
  0x71   : > { %1223 = vmatpush3.bf16.msra.mxu0 %v1430_v13  ;;  %1337 = vmatpush3.bf16.msra.mxu1 %v1430_v13 }
  0x72   : > { %1224 = vmatprep.subr.bf16.mxu0 %v1431_v14  ;;  %1330 = vmatprep.subr.bf16.mxu1 %v1431_v14 }
  0x75   : > { %1225 = vmatpush3.bf16.msra.mxu0 %v1432_v15  ;;  %1338 = vmatpush3.bf16.msra.mxu1 %v1432_v15 }
  0x76   : > { %1226 = vmatprep.subr.bf16.mxu0 %v1433_v16  ;;  %1331 = vmatprep.subr.bf16.mxu1 %v1433_v16 }
  0x79   : > { %1227 = vmatpush3.bf16.msra.mxu0 %v1434_v17  ;;  %1339 = vmatpush3.bf16.msra.mxu1 %v1434_v17 }
  0x7c   : > { %681 = vmatmul.mubr.bf16.vlgmr.msra.gmra.mrb[0].mxu0 %v1435_v18  ;;  %745 = vmatmul.mubr.bf16.vlgmr.msra.gmra.mrb[0].mxu1 %v1438_v19 }
  0x7d   : > { %688 = vmatprep.mubr.bf16.mxu0 %v1441_v20  ;;  %752 = vmatprep.mubr.bf16.mxu1 %v1443_v21 }
  0x84   : > { %689 = vmatmul.mubr.bf16.gmra.mrb[4].mxu0 %v1445_v22  ;;  %753 = vmatmul.mubr.bf16.gmra.mrb[4].mxu1 %v1446_v23 }
  0x85   : > { %696 = vmatprep.mubr.bf16.mxu0 %v1447_v24  ;;  %760 = vmatprep.mubr.bf16.mxu1 %v1449_v25 }
  0x8c   : > { %697 = vmatmul.mubr.bf16.gmra.mrb[8].mxu0 %v1451_v26  ;;  %761 = vmatmul.mubr.bf16.gmra.mrb[8].mxu1 %v1452_v27 }
  0x8d   : > { %704 = vmatprep.mubr.bf16.mxu0 %v1453_v28  ;;  %768 = vmatprep.mubr.bf16.mxu1 %v1455_v29 }
  0x94   : > { %705 = vmatmul.mubr.bf16.gmra.mrb[12].mxu0 %v1457_v30  ;;  %769 = vmatmul.mubr.bf16.gmra.mrb[12].mxu1 %v1458_v31 }
  0x95   : > { %712 = vmatprep.mubr.bf16.mxu0 %v1459_v32  ;;  %776 = vmatprep.mubr.bf16.mxu1 %v1461_v33 }
  0x9c   : > { %713 = vmatmul.mubr.bf16.gmra.mrb[16].mxu0 %v1463_v34  ;;  %777 = vmatmul.mubr.bf16.gmra.mrb[16].mxu1 %v1464_v35 }
  0x9d   : > { %720 = vmatprep.mubr.bf16.mxu0 %v1465_v36  ;;  %784 = vmatprep.mubr.bf16.mxu1 %v1467_v37 }
  0xa4   : > { %721 = vmatmul.mubr.bf16.gmra.mrb[20].mxu0 %v1469_v38  ;;  %785 = vmatmul.mubr.bf16.gmra.mrb[20].mxu1 %v1470_v39 }
  0xa5   : > { %728 = vmatprep.mubr.bf16.mxu0 %v1471_v40  ;;  %792 = vmatprep.mubr.bf16.mxu1 %v1473_v41 }
  0xac   : > { %729 = vmatmul.mubr.bf16.gmra.mrb[24].mxu0 %v1475_v42  ;;  %793 = vmatmul.mubr.bf16.gmra.mrb[24].mxu1 %v1476_v43 }
  0xad   : > { %736 = vmatprep.mubr.bf16.mxu0 %v1477_v44  ;;  %800 = vmatprep.mubr.bf16.mxu1 %v1479_v45 }
  0xb4   : > { %737 = vmatmul.mubr.bf16.gmra.mrb[28].mxu0 %v1481_v46  ;;  %801 = vmatmul.mubr.bf16.gmra.mrb[28].mxu1 %v1482_v47 }
 0x14f   : > { %v1228_v48 = vpop.f32.mrb[0].mxu0  ;;  %v1276_v49 = vpop.f32.mrb[0].mxu1 }
 0x150   : > { %v1229_v50 = vpop.f32.mrb[1].mxu0  ;;  %v1277_v52 = vpop.f32.mrb[1].mxu1 }
 0x151   : > { %v1230_v53 = vadd.f32 %v1229_v50, %v1228_v48  ;;  %v1278_v54 = vadd.f32 %v1277_v52, %v1276_v49  ;;  %v1231_v55 = vpop.f32.mrb[2].mxu0  ;;  %v1279_v56 = vpop.f32.mrb[2].mxu1 }
 0x152   : > { %v1232_v57 = vpop.f32.mrb[3].mxu0  ;;  %v1280_v58 = vpop.f32.mrb[3].mxu1 }
 0x153   : > { %v915_v59 = vadd.f32 %v1230_v53, %v1860_v51  ;;  %v931_v60 = vadd.f32 %v1278_v54, %v1860_v51  ;;  %v1233_v61 = vadd.f32 %v1232_v57, %v1231_v55  ;;  %v1281_v62 = vadd.f32 %v1280_v58, %v1279_v56 }
 0x155   : > { %v947_v63 = vmax.f32 %v915_v59, 0.0  ;;  %v963_v0 = vmax.f32 %v931_v60, 0.0  ;;  %v916_v1 = vadd.f32 %v1233_v61, %v1860_v51  ;;  %v932_v2 = vadd.f32 %v1281_v62, %v1860_v51 }
 0x157   : > { %979 = vst [vmem:[%s1868_s24] sm:$0xff] %v947_v63  ;;  %995 = vst [vmem:[%s1868_s24 + $0x80] sm:$0xff] %v963_v0  ;;  %v948_v3 = vmax.f32 %v916_v1, 0.0  ;;  %v964_v4 = vmax.f32 %v932_v2, 0.0  ;;  %v1234_v5 = vpop.f32.mrb[4].mxu0  ;;  %v1282_v6 = vpop.f32.mrb[4].mxu1 }
 0x158   : > { %v1235_v7 = vpop.f32.mrb[5].mxu0  ;;  %v1283_v8 = vpop.f32.mrb[5].mxu1 }
 0x159   : > { %980 = vst [vmem:[%s1868_s24 + $0x8] sm:$0xff] %v948_v3  ;;  %996 = vst [vmem:[%s1868_s24 + $0x88] sm:$0xff] %v964_v4  ;;  %v1236_v9 = vadd.f32 %v1235_v7, %v1234_v5  ;;  %v1284_v10 = vadd.f32 %v1283_v8, %v1282_v6  ;;  %v1237_v11 = vpop.f32.mrb[6].mxu0  ;;  %v1285_v12 = vpop.f32.mrb[6].mxu1 }
 0x15a   : > { %v1238_v13 = vpop.f32.mrb[7].mxu0  ;;  %v1286_v14 = vpop.f32.mrb[7].mxu1 }
 0x15b   : > { %v917_v15 = vadd.f32 %v1236_v9, %v1860_v51  ;;  %v933_v16 = vadd.f32 %v1284_v10, %v1860_v51  ;;  %v1239_v17 = vadd.f32 %v1238_v13, %v1237_v11  ;;  %v1287_v18 = vadd.f32 %v1286_v14, %v1285_v12 }
 0x15d   : > { %v949_v19 = vmax.f32 %v917_v15, 0.0  ;;  %v965_v20 = vmax.f32 %v933_v16, 0.0  ;;  %v918_v21 = vadd.f32 %v1239_v17, %v1860_v51  ;;  %v934_v22 = vadd.f32 %v1287_v18, %v1860_v51 }
 0x15f   : > { %981 = vst [vmem:[%s1868_s24 + $0x10] sm:$0xff] %v949_v19  ;;  %997 = vst [vmem:[%s1868_s24 + $0x90] sm:$0xff] %v965_v20  ;;  %v950_v23 = vmax.f32 %v918_v21, 0.0  ;;  %v966_v24 = vmax.f32 %v934_v22, 0.0  ;;  %v1240_v25 = vpop.f32.mrb[8].mxu0  ;;  %v1288_v26 = vpop.f32.mrb[8].mxu1 }
 0x160   : > { %v1241_v27 = vpop.f32.mrb[9].mxu0  ;;  %v1289_v28 = vpop.f32.mrb[9].mxu1 }
 0x161   : > { %982 = vst [vmem:[%s1868_s24 + $0x18] sm:$0xff] %v950_v23  ;;  %998 = vst [vmem:[%s1868_s24 + $0x98] sm:$0xff] %v966_v24  ;;  %v1242_v29 = vadd.f32 %v1241_v27, %v1240_v25  ;;  %v1290_v30 = vadd.f32 %v1289_v28, %v1288_v26  ;;  %v1243_v31 = vpop.f32.mrb[10].mxu0  ;;  %v1291_v32 = vpop.f32.mrb[10].mxu1 }
 0x162   : > { %v1244_v33 = vpop.f32.mrb[11].mxu0  ;;  %v1292_v34 = vpop.f32.mrb[11].mxu1 }
 0x163   : > { %v919_v35 = vadd.f32 %v1242_v29, %v1860_v51  ;;  %v935_v36 = vadd.f32 %v1290_v30, %v1860_v51  ;;  %v1245_v37 = vadd.f32 %v1244_v33, %v1243_v31  ;;  %v1293_v38 = vadd.f32 %v1292_v34, %v1291_v32 }
 0x165   : > { %v951_v39 = vmax.f32 %v919_v35, 0.0  ;;  %v967_v40 = vmax.f32 %v935_v36, 0.0  ;;  %v920_v41 = vadd.f32 %v1245_v37, %v1860_v51  ;;  %v936_v42 = vadd.f32 %v1293_v38, %v1860_v51 }
 0x167   : > { %983 = vst [vmem:[%s1868_s24 + $0x20] sm:$0xff] %v951_v39  ;;  %999 = vst [vmem:[%s1868_s24 + $0xa0] sm:$0xff] %v967_v40  ;;  %v952_v43 = vmax.f32 %v920_v41, 0.0  ;;  %v968_v44 = vmax.f32 %v936_v42, 0.0  ;;  %v1246_v45 = vpop.f32.mrb[12].mxu0  ;;  %v1294_v46 = vpop.f32.mrb[12].mxu1 }
 0x168   : > { %v1247_v47 = vpop.f32.mrb[13].mxu0  ;;  %v1295_v48 = vpop.f32.mrb[13].mxu1 }
 0x169   : > { %984 = vst [vmem:[%s1868_s24 + $0x28] sm:$0xff] %v952_v43  ;;  %1000 = vst [vmem:[%s1868_s24 + $0xa8] sm:$0xff] %v968_v44  ;;  %v1248_v49 = vadd.f32 %v1247_v47, %v1246_v45  ;;  %v1296_v50 = vadd.f32 %v1295_v48, %v1294_v46  ;;  %v1249_v52 = vpop.f32.mrb[14].mxu0  ;;  %v1297_v53 = vpop.f32.mrb[14].mxu1 }
 0x16a   : > { %v1250_v54 = vpop.f32.mrb[15].mxu0  ;;  %v1298_v55 = vpop.f32.mrb[15].mxu1 }
 0x16b   : > { %v921_v56 = vadd.f32 %v1248_v49, %v1860_v51  ;;  %v937_v57 = vadd.f32 %v1296_v50, %v1860_v51  ;;  %v1251_v58 = vadd.f32 %v1250_v54, %v1249_v52  ;;  %v1299_v59 = vadd.f32 %v1298_v55, %v1297_v53 }
 0x16d   : > { %v953_v60 = vmax.f32 %v921_v56, 0.0  ;;  %v969_v61 = vmax.f32 %v937_v57, 0.0  ;;  %v922_v62 = vadd.f32 %v1251_v58, %v1860_v51  ;;  %v938_v63 = vadd.f32 %v1299_v59, %v1860_v51 }
 0x16f   : > { %985 = vst [vmem:[%s1868_s24 + $0x30] sm:$0xff] %v953_v60  ;;  %1001 = vst [vmem:[%s1868_s24 + $0xb0] sm:$0xff] %v969_v61  ;;  %v954_v0 = vmax.f32 %v922_v62, 0.0  ;;  %v970_v1 = vmax.f32 %v938_v63, 0.0  ;;  %v1252_v2 = vpop.f32.mrb[16].mxu0  ;;  %v1300_v3 = vpop.f32.mrb[16].mxu1 }
 0x170   : > { %v1253_v4 = vpop.f32.mrb[17].mxu0  ;;  %v1301_v5 = vpop.f32.mrb[17].mxu1 }
 0x171   : > { %986 = vst [vmem:[%s1868_s24 + $0x38] sm:$0xff] %v954_v0  ;;  %1002 = vst [vmem:[%s1868_s24 + $0xb8] sm:$0xff] %v970_v1  ;;  %v1254_v6 = vadd.f32 %v1253_v4, %v1252_v2  ;;  %v1302_v7 = vadd.f32 %v1301_v5, %v1300_v3  ;;  %v1255_v8 = vpop.f32.mrb[18].mxu0  ;;  %v1303_v9 = vpop.f32.mrb[18].mxu1 }
 0x172   : > { %v1256_v10 = vpop.f32.mrb[19].mxu0  ;;  %v1304_v11 = vpop.f32.mrb[19].mxu1 }
 0x173   : > { %v923_v12 = vadd.f32 %v1254_v6, %v1860_v51  ;;  %v939_v13 = vadd.f32 %v1302_v7, %v1860_v51  ;;  %v1257_v14 = vadd.f32 %v1256_v10, %v1255_v8  ;;  %v1305_v15 = vadd.f32 %v1304_v11, %v1303_v9 }
 0x175   : > { %v955_v16 = vmax.f32 %v923_v12, 0.0  ;;  %v971_v17 = vmax.f32 %v939_v13, 0.0  ;;  %v924_v18 = vadd.f32 %v1257_v14, %v1860_v51  ;;  %v940_v19 = vadd.f32 %v1305_v15, %v1860_v51 }
 0x177   : > { %987 = vst [vmem:[%s1868_s24 + $0x40] sm:$0xff] %v955_v16  ;;  %1003 = vst [vmem:[%s1868_s24 + $0xc0] sm:$0xff] %v971_v17  ;;  %v956_v20 = vmax.f32 %v924_v18, 0.0  ;;  %v972_v21 = vmax.f32 %v940_v19, 0.0  ;;  %v1258_v22 = vpop.f32.mrb[20].mxu0  ;;  %v1306_v23 = vpop.f32.mrb[20].mxu1 }
 0x178   : > { %v1259_v24 = vpop.f32.mrb[21].mxu0  ;;  %v1307_v25 = vpop.f32.mrb[21].mxu1 }
 0x179   : > { %988 = vst [vmem:[%s1868_s24 + $0x48] sm:$0xff] %v956_v20  ;;  %1004 = vst [vmem:[%s1868_s24 + $0xc8] sm:$0xff] %v972_v21  ;;  %v1260_v26 = vadd.f32 %v1259_v24, %v1258_v22  ;;  %v1308_v27 = vadd.f32 %v1307_v25, %v1306_v23  ;;  %v1261_v28 = vpop.f32.mrb[22].mxu0  ;;  %v1309_v29 = vpop.f32.mrb[22].mxu1 }
 0x17a   : > { %v1262_v30 = vpop.f32.mrb[23].mxu0  ;;  %v1310_v31 = vpop.f32.mrb[23].mxu1 }
 0x17b   : > { %v925_v32 = vadd.f32 %v1260_v26, %v1860_v51  ;;  %v941_v33 = vadd.f32 %v1308_v27, %v1860_v51  ;;  %v1263_v34 = vadd.f32 %v1262_v30, %v1261_v28  ;;  %v1311_v35 = vadd.f32 %v1310_v31, %v1309_v29 }
 0x17d   : > { %v957_v36 = vmax.f32 %v925_v32, 0.0  ;;  %v973_v37 = vmax.f32 %v941_v33, 0.0  ;;  %v926_v38 = vadd.f32 %v1263_v34, %v1860_v51  ;;  %v942_v39 = vadd.f32 %v1311_v35, %v1860_v51 }
 0x17f   : > { %989 = vst [vmem:[%s1868_s24 + $0x50] sm:$0xff] %v957_v36  ;;  %1005 = vst [vmem:[%s1868_s24 + $0xd0] sm:$0xff] %v973_v37  ;;  %v958_v40 = vmax.f32 %v926_v38, 0.0  ;;  %v974_v41 = vmax.f32 %v942_v39, 0.0  ;;  %v1264_v42 = vpop.f32.mrb[24].mxu0  ;;  %v1312_v43 = vpop.f32.mrb[24].mxu1 }
 0x180   : > { %v1265_v44 = vpop.f32.mrb[25].mxu0  ;;  %v1313_v45 = vpop.f32.mrb[25].mxu1 }
 0x181   : > { %990 = vst [vmem:[%s1868_s24 + $0x58] sm:$0xff] %v958_v40  ;;  %1006 = vst [vmem:[%s1868_s24 + $0xd8] sm:$0xff] %v974_v41  ;;  %v1266_v46 = vadd.f32 %v1265_v44, %v1264_v42  ;;  %v1314_v47 = vadd.f32 %v1313_v45, %v1312_v43  ;;  %v1267_v48 = vpop.f32.mrb[26].mxu0  ;;  %v1315_v49 = vpop.f32.mrb[26].mxu1 }
 0x182   : > { %v1268_v50 = vpop.f32.mrb[27].mxu0  ;;  %v1316_v52 = vpop.f32.mrb[27].mxu1 }
 0x183   : > { %v927_v53 = vadd.f32 %v1266_v46, %v1860_v51  ;;  %v943_v54 = vadd.f32 %v1314_v47, %v1860_v51  ;;  %v1269_v55 = vadd.f32 %v1268_v50, %v1267_v48  ;;  %v1317_v56 = vadd.f32 %v1316_v52, %v1315_v49 }
 0x185   : > { %v959_v57 = vmax.f32 %v927_v53, 0.0  ;;  %v975_v58 = vmax.f32 %v943_v54, 0.0  ;;  %v928_v59 = vadd.f32 %v1269_v55, %v1860_v51  ;;  %v944_v60 = vadd.f32 %v1317_v56, %v1860_v51 }
 0x187   : > { %991 = vst [vmem:[%s1868_s24 + $0x60] sm:$0xff] %v959_v57  ;;  %1007 = vst [vmem:[%s1868_s24 + $0xe0] sm:$0xff] %v975_v58  ;;  %v960_v61 = vmax.f32 %v928_v59, 0.0  ;;  %v976_v62 = vmax.f32 %v944_v60, 0.0  ;;  %v1270_v63 = vpop.f32.mrb[28].mxu0  ;;  %v1318_v0 = vpop.f32.mrb[28].mxu1 }
 0x188   : > { %v1271_v1 = vpop.f32.mrb[29].mxu0  ;;  %v1319_v2 = vpop.f32.mrb[29].mxu1 }
 0x189   : > { %992 = vst [vmem:[%s1868_s24 + $0x68] sm:$0xff] %v960_v61  ;;  %1008 = vst [vmem:[%s1868_s24 + $0xe8] sm:$0xff] %v976_v62  ;;  %v1272_v3 = vadd.f32 %v1271_v1, %v1270_v63  ;;  %v1320_v4 = vadd.f32 %v1319_v2, %v1318_v0  ;;  %v1273_v5 = vpop.f32.mrb[30].mxu0  ;;  %v1321_v6 = vpop.f32.mrb[30].mxu1 }
 0x18a   : > { %v1274_v7 = vpop.f32.mrb[31].mxu0  ;;  %v1322_v8 = vpop.f32.mrb[31].mxu1 }
 0x18b   : > { %v929_v9 = vadd.f32 %v1272_v3, %v1860_v51  ;;  %v945_v10 = vadd.f32 %v1320_v4, %v1860_v51  ;;  %v1275_v11 = vadd.f32 %v1274_v7, %v1273_v5  ;;  %v1323_v12 = vadd.f32 %v1322_v8, %v1321_v6 }
 0x18d   : > { %v961_v13 = vmax.f32 %v929_v9, 0.0  ;;  %v977_v14 = vmax.f32 %v945_v10, 0.0  ;;  %v930_v15 = vadd.f32 %v1275_v11, %v1860_v51  ;;  %v946_v16 = vadd.f32 %v1323_v12, %v1860_v51 }
 0x18f   : > { %993 = vst [vmem:[%s1868_s24 + $0x70] sm:$0xff] %v961_v13  ;;  %1009 = vst [vmem:[%s1868_s24 + $0xf0] sm:$0xff] %v977_v14  ;;  %v962_v17 = vmax.f32 %v930_v15, 0.0  ;;  %v978_v18 = vmax.f32 %v946_v16, 0.0 }
 0x191   : > { %994 = vst [vmem:[%s1868_s24 + $0x78] sm:$0xff] %v962_v17  ;;  %1010 = vst [vmem:[%s1868_s24 + $0xf8] sm:$0xff] %v978_v18 }
 0x192   : > { %1554 = shalt.err (!%p1551_p5)
}
 0x193   : > { %s1555_s25 = scalar_lea.hbm %s1931_s26, 4096  ;;  %s1559_s6 = scalar_lea.hbm %s1988_s3, 32768 }
 0x194   : > { %p1556_p9 = scmp.ne.s32.totalorder %s1931_s26, %s1555_s25  ;;  %p1560_p3 = scmp.lt.u32.totalorder %s1931_s26, %s1988_s3 }
 0x195   : > { %p1561_p7 = scmp.lt.u32.totalorder %s1559_s6, %s1555_s25  ;;  %p1563_p4 = scmp.lt.u32.totalorder %s1555_s25, %s1931_s26 }
 0x196   : > { %p1557_p1 = pnand %p1556_p9, %p1753_p11 }
 0x197   : > { %p1562_p13 = por %p1561_p7, %p1560_p3 }
 0x198   : > { %p1558_p2 = pneg %p1557_p1 }
 0x199   : > { %p1564_p6 = por %p1563_p4, %p1562_p13 }
 0x19b   : > { %p1565_p8 = pnand %p1564_p6, %p1558_p2 }
 0x19d   : > { %1568 = shalt.err (!%p1565_p8)
}
 0x19e   : > { %s1636_s24 = smov 128   ;;  %s1637_s9 = smov 8  }
 0x19f   : > { %1346 = dma.vmem_to_hbm [thread:$0]  (%p1753_p11), %s1933_s10, 4096, %s1931_s26, %s1012_s15, %s1636_s24, %s1636_s24, %s1637_s9  }
 0x1a0 PF: > { %p1363_p12 = scmp.ge.s32.totalorder %s1627_s17, 2  ;;  %s1041_s11 = sand.u32 1, %s1607_s12  }
 0x1a1   : > { %p2006_p10 = scmp.ne.s32.totalorder %s1996_s23, 0  ;;  %s1042_s18 = scalar_lea.sflag [#allocation5], %s1041_s11 }
 0x1a3   : > { %p1357_p0 = pnand %p1363_p12, %p2006_p10 }
 0x1a5   : > { %1602 = dma.done.wait (!%p1357_p0), %s1042_s18, 4096  }
 0x1a6   : > { %1604 = vsyncadd (!%p1357_p0), %s1042_s18, 4294963200  ;;  %s20_s17 = sadd.s32 1, %s1627_s17   ;;  %s2007_s12 = smov %s1611_s13 }
 0x1a7   : > { %p17_p5 = scmp.ge.s32.totalorder %s20_s17, 10   ;;  %s2008_s13 = smov %s1615_s14 }
 0x1a8   : > { %s2009_s14 = smov %s1762_s5  ;;  %s2010_s15 = smov %s1623_s16 }
 0x1a9   : > { %s2011_s16 = smov %s2013_s28  ;;  %19 = sbr.rel (!%p17_p5) target bundleno = 7 (0x7), region = 93 }
 0x1b0   :  { %1047 = vsyncpa [#allocation4], 1 }
 0x1b1   :  { %1049 = vsyncpa [#allocation4 + $0x1], 1 }
 0x1b2   :  { %1050 = vsyncpa [#allocation7], 1 }
 0x1b3   :  { %1051 = vsyncpa [#allocation5], 1 }
 0x1b4   :  { %1053 = vsyncpa [#allocation5 + $0x1], 1 }

</bundles_post_ra>
